<compile_context>
chip_gen: v7x
topology: tpu7x:2x2x1
jax: 0.10.0
libtpu: 0.0.40
codegen_flags: <defaults>
</compile_context>

<pallas_src>
import jax
import jax.numpy as jnp
from jax.experimental import pallas as pl
from jax.experimental.pallas import tpu as pltpu


def _leaky_relu(x, negative_slope=0.01):
    # max(x, 0.01*x) == leaky_relu(x) for all finite x; one VALU op cheaper
    # than compare+select.  Matches torch.nn.functional.leaky_relu default.
    return jnp.maximum(x, negative_slope * x)


def _round_up(n, m):
    return ((n + m - 1) // m) * m


def mlp_kernel(x_ref, w1_ref, b1_ref, w2_ref, b2_ref, w3_ref, b3_ref, o_ref):
    # fc1 + leaky_relu  (bf16 operands on the MXU, f32 accumulate).  astype is
    # a no-op when the caller already supplies bf16 activations.
    x = x_ref[...].astype(jnp.bfloat16)
    h = jnp.dot(x, w1_ref[...], preferred_element_type=jnp.float32) + b1_ref[...]
    h = _leaky_relu(h)

    # fc2 + leaky_relu
    h = jnp.dot(h.astype(jnp.bfloat16), w2_ref[...],
                preferred_element_type=jnp.float32) + b2_ref[...]
    h = _leaky_relu(h)

    # fc3 + leaky_relu (PyTorch Net applies leaky_relu after fc3 too)
    h = jnp.dot(h.astype(jnp.bfloat16), w3_ref[...],
                preferred_element_type=jnp.float32) + b3_ref[...]
    h = _leaky_relu(h)

    # sigmoid: exp -> EUP, approximate reciprocal -> EUP (keeps VALU free)
    o_ref[...] = pl.reciprocal(1.0 + jnp.exp(-h), approx=True).astype(o_ref.dtype)


def net_forward(x, params, *, tm=512):
    """x: (batch, width*height*3) float32 or bfloat16; params: w* bf16, b* f32."""
    w1, b1 = params["w1"], params["b1"]
    w2, b2 = params["w2"], params["b2"]
    w3, b3 = params["w3"], params["b3"]

    batch, d_in = x.shape
    out_dim = w3.shape[1]

    # Batch tile: large tiles amortize per-grid-step overhead, but cap at half
    # the (sublane-rounded) batch so there are >=2 grid steps for the v7x
    # megacore split.  Always a multiple of 8 sublanes.  The ragged final
    # block (batch % tm_eff != 0) is masked by Pallas -- no jnp.pad needed.
    half = _round_up(pl.cdiv(_round_up(max(batch, 1), 8), 2), 8)
    tm_eff = max(8, min(tm, half))
    grid = (pl.cdiv(batch, tm_eff),)

    const0 = lambda a: pl.BlockSpec(a.shape, lambda i: (0, 0))  # VMEM-resident

    return pl.pallas_call(
        mlp_kernel,
        out_shape=jax.ShapeDtypeStruct((batch, out_dim), jnp.float32),
        grid=grid,
        in_specs=[
            pl.BlockSpec((tm_eff, d_in), lambda i: (i, 0)),   # x tile per step
            const0(w1), const0(b1),
            const0(w2), const0(b2),
            const0(w3), const0(b3),
        ],
        out_specs=pl.BlockSpec((tm_eff, out_dim), lambda i: (i, 0)),
        compiler_params=pltpu.CompilerParams(
            dimension_semantics=("parallel",),   # shard batch tiles across TCs (v7x)
            vmem_limit_bytes=32 * 1024 * 1024,   # v6e/v7x default; headroom on v5e
        ),
    )(x, w1, b1, w2, b2, w3, b3)


def init_params(key, width, height):
    """Deterministic init mimicking nn.Linear's uniform(-1/sqrt(fan_in), ...).

    Weights are stored transposed vs. PyTorch, shape (in, out), in bfloat16
    (the kernel is weight-DMA bound at small batch).  Biases are (1, out) f32.
    """
    d_in = width * height * 3
    d_h1 = width * height * 2
    d_h2 = width * height * 1
    d_out = 4

    def linear(k, fan_in, fan_out):
        kw, kb = jax.random.split(k)
        bound = 1.0 / jnp.sqrt(fan_in)
        w = jax.random.uniform(kw, (fan_in, fan_out), jnp.float32, -bound, bound)
        b = jax.random.uniform(kb, (1, fan_out), jnp.float32, -bound, bound)
        return w.astype(jnp.bfloat16), b

    k1, k2, k3 = jax.random.split(key, 3)
    w1, b1 = linear(k1, d_in, d_h1)
    w2, b2 = linear(k2, d_h1, d_h2)
    w3, b3 = linear(k3, d_h2, d_out)
    return {"w1": w1, "b1": b1, "w2": w2, "b2": b2, "w3": w3, "b3": b3}


def ref_forward(x, p):
    """Pure-JAX reference: f32 math with the (bf16-stored) weights upcast to f32."""
    def layer(h, w, b):
        z = h.astype(jnp.float32) @ w.astype(jnp.float32) + b
        return jnp.where(z >= 0, z, 0.01 * z)

    h = layer(x, p["w1"], p["b1"])
    h = layer(h, p["w2"], p["b2"])
    h = layer(h, p["w3"], p["b3"])
    return jax.nn.sigmoid(h)


if __name__ == "__main__":
    width, height = 16, 16            # -> in = 768, h1 = 512, h2 = 256, out = 4
    d_in = width * height * 3

    key = jax.random.PRNGKey(0)
    kp, kx1, kx2 = jax.random.split(key, 3)
    params = init_params(kp, width, height)

    # Small batch: single 8-row (ragged) tile, grid=(1,).
    x_small = jax.random.normal(kx1, (2, d_in), jnp.float32)
    out_small = net_forward(x_small, params)
    jax.block_until_ready(out_small)
    assert out_small.shape == (2, 4)
    assert jnp.allclose(out_small, ref_forward(x_small, params), atol=2e-2), \
        "mismatch vs reference (small batch)"

    # Larger batch exercises 2-way tiling with a masked ragged final block
    # (260 rows, tm_eff=136 -> grid=(2,), last block 12 rows out of bounds).
    x_big = jax.random.normal(kx2, (260, d_in), jnp.float32)
    out_big = net_forward(x_big, params)
    jax.block_until_ready(out_big)
    assert out_big.shape == (260, 4)
    assert jnp.allclose(out_big, ref_forward(x_big, params), atol=2e-2), \
        "mismatch vs reference (tiled / ragged batch)"

    # bf16 activations straight from the "producer" (halves x HBM traffic);
    # compare against the reference evaluated on the same bf16 input.
    x_bf16 = x_big.astype(jnp.bfloat16)
    out_bf16 = net_forward(x_bf16, params)
    jax.block_until_ready(out_bf16)
    assert jnp.allclose(out_bf16, ref_forward(x_bf16, params), atol=2e-2), \
        "mismatch vs reference (bf16 input)"

    print("KERNEL_OK")
</pallas_src>

<mosaic_0001>
module attributes {stable_mosaic.version = 11 : i64} {
  func.func @mlp_kernel(%arg0: i32, %arg1: memref<8x768xf32, #tpu.memory_space<vmem>>, %arg2: memref<768x512xbf16, #tpu.memory_space<vmem>>, %arg3: memref<1x512xf32, #tpu.memory_space<vmem>>, %arg4: memref<512x256xbf16, #tpu.memory_space<vmem>>, %arg5: memref<1x256xf32, #tpu.memory_space<vmem>>, %arg6: memref<256x4xbf16, #tpu.memory_space<vmem>>, %arg7: memref<1x4xf32, #tpu.memory_space<vmem>>, %arg8: memref<8x4xf32, #tpu.memory_space<vmem>>) attributes {dimension_semantics = [#tpu.dimension_semantics<parallel>], iteration_bounds = array<i64: 1>, scalar_prefetch = 0 : i64, scratch_operands = 0 : i64, tpu.core_type = #tpu.core_type<tc>, window_params = [{transform_indices = @transform_0, window_bounds = array<i64: 8, 768>}, {pipeline_mode = #tpu.pipeline_mode<synchronous>, transform_indices = @transform_1, window_bounds = array<i64: 768, 512>}, {pipeline_mode = #tpu.pipeline_mode<synchronous>, transform_indices = @transform_2, window_bounds = array<i64: 1, 512>}, {pipeline_mode = #tpu.pipeline_mode<synchronous>, transform_indices = @transform_3, window_bounds = array<i64: 512, 256>}, {pipeline_mode = #tpu.pipeline_mode<synchronous>, transform_indices = @transform_4, window_bounds = array<i64: 1, 256>}, {pipeline_mode = #tpu.pipeline_mode<synchronous>, transform_indices = @transform_5, window_bounds = array<i64: 256, 4>}, {pipeline_mode = #tpu.pipeline_mode<synchronous>, transform_indices = @transform_6, window_bounds = array<i64: 1, 4>}, {transform_indices = @transform_7, window_bounds = array<i64: 8, 4>}]} {
    %c0 = arith.constant 0 : index
    %c0_0 = arith.constant 0 : index
    %0 = vector.load %arg1[%c0, %c0_0] : memref<8x768xf32, #tpu.memory_space<vmem>>, vector<8x768xf32>
    %1 = arith.truncf %0 : vector<8x768xf32> to vector<8x768xbf16>
    %c0_1 = arith.constant 0 : index
    %c0_2 = arith.constant 0 : index
    %2 = vector.load %arg2[%c0_1, %c0_2] : memref<768x512xbf16, #tpu.memory_space<vmem>>, vector<768x512xbf16>
    %cst = arith.constant dense<0.000000e+00> : vector<8x512xf32>
    %3 = tpu.matmul %1, %2, %cst {dimension_numbers = #tpu.dot_dimension_numbers<[1], [0], [0], [1], [0, 0, 1, 1], [], []>} : vector<8x768xbf16>, vector<768x512xbf16>, vector<8x512xf32> -> vector<8x512xf32>
    %c0_3 = arith.constant 0 : index
    %c0_4 = arith.constant 0 : index
    %4 = vector.load %arg3[%c0_3, %c0_4] : memref<1x512xf32, #tpu.memory_space<vmem>>, vector<1x512xf32>
    %5 = vector.broadcast %4 : vector<1x512xf32> to vector<8x512xf32>
    %6 = arith.addf %3, %5 : vector<8x512xf32>
    %cst_5 = arith.constant 0.00999999977 : f32
    %7 = vector.broadcast %cst_5 : f32 to vector<8x512xf32>
    %8 = arith.mulf %7, %6 : vector<8x512xf32>
    %9 = arith.maximumf %6, %8 : vector<8x512xf32>
    %10 = arith.truncf %9 : vector<8x512xf32> to vector<8x512xbf16>
    %c0_6 = arith.constant 0 : index
    %c0_7 = arith.constant 0 : index
    %11 = vector.load %arg4[%c0_6, %c0_7] : memref<512x256xbf16, #tpu.memory_space<vmem>>, vector<512x256xbf16>
    %cst_8 = arith.constant dense<0.000000e+00> : vector<8x256xf32>
    %12 = tpu.matmul %10, %11, %cst_8 {dimension_numbers = #tpu.dot_dimension_numbers<[1], [0], [0], [1], [0, 0, 1, 1], [], []>} : vector<8x512xbf16>, vector<512x256xbf16>, vector<8x256xf32> -> vector<8x256xf32>
    %c0_9 = arith.constant 0 : index
    %c0_10 = arith.constant 0 : index
    %13 = vector.load %arg5[%c0_9, %c0_10] : memref<1x256xf32, #tpu.memory_space<vmem>>, vector<1x256xf32>
    %14 = vector.broadcast %13 : vector<1x256xf32> to vector<8x256xf32>
    %15 = arith.addf %12, %14 : vector<8x256xf32>
    %cst_11 = arith.constant 0.00999999977 : f32
    %16 = vector.broadcast %cst_11 : f32 to vector<8x256xf32>
    %17 = arith.mulf %16, %15 : vector<8x256xf32>
    %18 = arith.maximumf %15, %17 : vector<8x256xf32>
    %19 = arith.truncf %18 : vector<8x256xf32> to vector<8x256xbf16>
    %c0_12 = arith.constant 0 : index
    %c0_13 = arith.constant 0 : index
    %20 = vector.load %arg6[%c0_12, %c0_13] : memref<256x4xbf16, #tpu.memory_space<vmem>>, vector<256x4xbf16>
    %cst_14 = arith.constant dense<0.000000e+00> : vector<8x4xf32>
    %21 = tpu.matmul %19, %20, %cst_14 {dimension_numbers = #tpu.dot_dimension_numbers<[1], [0], [0], [1], [0, 0, 1, 1], [], []>} : vector<8x256xbf16>, vector<256x4xbf16>, vector<8x4xf32> -> vector<8x4xf32>
    %c0_15 = arith.constant 0 : index
    %c0_16 = arith.constant 0 : index
    %22 = vector.load %arg7[%c0_15, %c0_16] : memref<1x4xf32, #tpu.memory_space<vmem>>, vector<1x4xf32>
    %23 = vector.broadcast %22 : vector<1x4xf32> to vector<8x4xf32>
    %24 = arith.addf %21, %23 : vector<8x4xf32>
    %cst_17 = arith.constant 0.00999999977 : f32
    %25 = vector.broadcast %cst_17 : f32 to vector<8x4xf32>
    %26 = arith.mulf %25, %24 : vector<8x4xf32>
    %27 = arith.maximumf %24, %26 : vector<8x4xf32>
    %cst_18 = arith.constant 0.000000e+00 : f32
    %28 = vector.broadcast %cst_18 : f32 to vector<8x4xf32>
    %29 = arith.subf %28, %27 : vector<8x4xf32>
    %30 = math.exp %29 : vector<8x4xf32>
    %cst_19 = arith.constant 1.000000e+00 : f32
    %31 = vector.broadcast %cst_19 : f32 to vector<8x4xf32>
    %32 = arith.addf %31, %30 : vector<8x4xf32>
    %33 = tpu.reciprocal %32 {approx = true} : vector<8x4xf32> -> vector<8x4xf32>
    %c0_20 = arith.constant 0 : index
    %c0_21 = arith.constant 0 : index
    %34 = vector.load %arg8[%c0_20, %c0_21] : memref<8x4xf32, #tpu.memory_space<vmem>>, vector<8x4xf32>
    tpu.vector_store %arg8[%c0_20, %c0_21], %33 {strides = array<i32>} : memref<8x4xf32, #tpu.memory_space<vmem>>, vector<8x4xf32>,
    return
  }
  func.func @transform_0(%arg0: i32) -> (i32, i32) {
    %c0_i32 = arith.constant 0 : i32
    %c0_i32_0 = arith.constant 0 : i32
    return %arg0, %c0_i32 : i32, i32
  }
  func.func @transform_1(%arg0: i32) -> (i32, i32) {
    %c0_i32 = arith.constant 0 : i32
    %c0_i32_0 = arith.constant 0 : i32
    %c0_i32_1 = arith.constant 0 : i32
    return %c0_i32, %c0_i32_0 : i32, i32
  }
  func.func @transform_2(%arg0: i32) -> (i32, i32) {
    %c0_i32 = arith.constant 0 : i32
    %c0_i32_0 = arith.constant 0 : i32
    %c0_i32_1 = arith.constant 0 : i32
    return %c0_i32, %c0_i32_0 : i32, i32
  }
  func.func @transform_3(%arg0: i32) -> (i32, i32) {
    %c0_i32 = arith.constant 0 : i32
    %c0_i32_0 = arith.constant 0 : i32
    %c0_i32_1 = arith.constant 0 : i32
    return %c0_i32, %c0_i32_0 : i32, i32
  }
  func.func @transform_4(%arg0: i32) -> (i32, i32) {
    %c0_i32 = arith.constant 0 : i32
    %c0_i32_0 = arith.constant 0 : i32
    %c0_i32_1 = arith.constant 0 : i32
    return %c0_i32, %c0_i32_0 : i32, i32
  }
  func.func @transform_5(%arg0: i32) -> (i32, i32) {
    %c0_i32 = arith.constant 0 : i32
    %c0_i32_0 = arith.constant 0 : i32
    %c0_i32_1 = arith.constant 0 : i32
    return %c0_i32, %c0_i32_0 : i32, i32
  }
  func.func @transform_6(%arg0: i32) -> (i32, i32) {
    %c0_i32 = arith.constant 0 : i32
    %c0_i32_0 = arith.constant 0 : i32
    %c0_i32_1 = arith.constant 0 : i32
    return %c0_i32, %c0_i32_0 : i32, i32
  }
  func.func @transform_7(%arg0: i32) -> (i32, i32) {
    %c0_i32 = arith.constant 0 : i32
    %c0_i32_0 = arith.constant 0 : i32
    return %arg0, %c0_i32 : i32, i32
  }
}

</mosaic_0001>

<bundles_post_ra>
// kernel: tpu_custom_call.1
= control target key start
LH: loop header
LB: loop body
LE: loop exit
PB: predicated region body
PF: predicated region fallthrough
CT: control target
= control target key end

     0   :  { %12 = vsyncpa [#allocation3], 0  ;;  %s3287_s0 = inlined_call_operand.vmem [shape: f32[2,768], index: 0, kind: input, shape index: {}]   ;;  %s3288_s1 = inlined_call_operand.hbm [shape: bf16[768,512], index: 1, kind: input, shape index: {}]   ;;  %s3289_s2 = inlined_call_operand.vmem [shape: f32[1,512], index: 2, kind: input, shape index: {}]   ;;  %s3290_s3 = inlined_call_operand.hbm [shape: bf16[512,256], index: 3, kind: input, shape index: {}]   ;;  %s3291_s4 = inlined_call_operand.vmem [shape: f32[1,256], index: 4, kind: input, shape index: {}]   ;;  %s3292_s5 = inlined_call_operand.vmem [shape: bf16[256,4], index: 5, kind: input, shape index: {}]   ;;  %s3293_s6 = inlined_call_operand.vmem [shape: f32[1,4], index: 6, kind: input, shape index: {}]   ;;  %s3294_s7 = inlined_call_operand.hbm [shape: f32[2,4], index: 7, kind: output, shape index: {}]  }
   0x1   :  { %13 = vsyncpa [#allocation6], 0 }
   0x2   :  { %14 = vsyncpa [#allocation4], 0  ;;  %s3069_s24 = smov [#allocation2]   ;;  %s2997_s28 = scalar_lea.hbm %s3288_s1, 24576 }
   0x3   :  { %s22_s25 = sshll.u32 %s3069_s24, 4  ;;  %p2998_p0 = scmp.ne.s32.totalorder %s3288_s1, %s2997_s28  ;;  %s23_s25 = int_to_ptr.vmem [resolvable:$true] %s22_s25 }
   0x4   :  { %p3001_p1 = scmp.lt.u32.totalorder %s2997_s28, %s3288_s1 }
   0x6   :  { %p3003_p2 = pnand %p3001_p1, %p2998_p0 }
   0x8   :  { %3006 = shalt.err (!%p3003_p2)
}
   0x9   :  { %s3007_s10 = scalar_lea.vmem %s23_s25, 24576  ;;  %p3012_p4 = scmp.lt.s32.totalorder %s23_s25, %s23_s25 }
   0xa   :  { %p3008_p3 = scmp.ne.s32.totalorder %s23_s25, %s3007_s10  ;;  %p3013_p5 = scmp.lt.s32.totalorder %s3007_s10, %s3007_s10 }
   0xc   :  { %p3014_p6 = por %p3013_p5, %p3012_p4 }
   0xe   :  { %p3015_p7 = pnand %p3014_p6, %p3008_p3 }
  0x10   :  { %3018 = shalt.err (!%p3015_p7)
}
  0x11   :  { %s3070_s11 = smov 256   ;;  %s3071_s12 = smov 16  }
  0x12   :  { %28 = dma.hbm_to_vmem [thread:$0]  %s3288_s1, 24576, %s23_s25, [#allocation3], %s3070_s11, %s3070_s11, %s3071_s12  }
  0x13   :  { %s3072_s15 = smov [#allocation5]   ;;  %s3019_s19 = scalar_lea.hbm %s3290_s3, 8192 }
  0x14   :  { %s36_s16 = sshll.u32 %s3072_s15, 4  ;;  %p3020_p8 = scmp.ne.s32.totalorder %s3290_s3, %s3019_s19  ;;  %s37_s16 = int_to_ptr.vmem [resolvable:$true] %s36_s16 }
  0x15   :  { %p3023_p9 = scmp.lt.u32.totalorder %s3019_s19, %s3290_s3 }
  0x17   :  { %p3025_p10 = pnand %p3023_p9, %p3020_p8 }
  0x19   :  { %3028 = shalt.err (!%p3025_p10)
}
  0x1a   :  { %s3029_s24 = scalar_lea.vmem %s37_s16, 8192  ;;  %p3034_p12 = scmp.lt.s32.totalorder %s37_s16, %s37_s16 }
  0x1b   :  { %p3030_p11 = scmp.ne.s32.totalorder %s37_s16, %s3029_s24  ;;  %p3035_p13 = scmp.lt.s32.totalorder %s3029_s24, %s3029_s24 }
  0x1d   :  { %p3036_p0 = por %p3035_p13, %p3034_p12 }
  0x1f   :  { %p3037_p1 = pnand %p3036_p0, %p3030_p11 }
  0x21   :  { %3040 = shalt.err (!%p3037_p1)
}
  0x22   :  { %s3073_s1 = smov 128   ;;  %s3074_s25 = smov 8  }
  0x23   :  { %42 = dma.hbm_to_vmem [thread:$0]  %s3290_s3, 8192, %s37_s16, [#allocation6], %s3073_s1, %s3073_s1, %s3074_s25  }
  0x24   :  { %3063 = dma.done.wait [#allocation3], 24576  }
  0x25   :  { %3064 = vsyncadd [#allocation3], 4294942720 }
  0x26   :  { %3065 = dma.done.wait [#allocation6], 8192  }
  0x27   :  { %3066 = vsyncadd [#allocation6], 4294959104  ;;  %v2585_v0 = vld [vmem:[#allocation2 + $0x4] ss:$16 sps:$4 sm:$0xff]   ;;  %v2589_v2 = vld [vmem:[#allocation2] ss:$16 sps:$4 sm:$0xff]   ;;  %v79_v40 = vlaneseq }
  0x28   :  { %v2587_v1 = vld [vmem:[#allocation2 + $0x204] ss:$16 sps:$4 sm:$0xff]   ;;  %1312 = vmatprep.subr.bf16.mxu1 %v2585_v0  ;;  %v2590_v3 = vld [vmem:[#allocation2 + $0x200] ss:$16 sps:$4 sm:$0xff]   ;;  %v3075_v38 = vmov 1983009808  }
  0x29   :  { %1353 = vmatprep.subr.bf16.mxu0 %v2587_v1  ;;  %v2591_v4 = vld [vmem:[#allocation2 + $0x24] ss:$16 sps:$4 sm:$0xff]   ;;  %1313 = vmatpush1.bf16.msra.mxu1 %v2589_v2  ;;  %v2595_v6 = vld [vmem:[#allocation2 + $0x20] ss:$16 sps:$4 sm:$0xff]   ;;  %v77_v39 = vunpack.c.l.s4 %v3075_v38  ;;  %v3143_v46 = vshrl.u32 %v79_v40, 7  ;;  %vm2236_vm0 = vcmask 31744  }
  0x2a   :  { %1354 = vmatpush1.bf16.msra.mxu0 %v2590_v3  ;;  %v2593_v5 = vld [vmem:[#allocation2 + $0x224] ss:$16 sps:$4 sm:$0xff]   ;;  %1314 = vmatprep.subr.bf16.mxu1 %v2591_v4  ;;  %v2596_v7 = vld [vmem:[#allocation2 + $0x220] ss:$16 sps:$4 sm:$0xff]   ;;  %v2686_v59 = vld [vmem:[%s3287_s0 + $0x1c] ss:$12 sps:$4 sm:$0xff]  }
  0x2b   :  { %1355 = vmatprep.subr.bf16.mxu0 %v2593_v5  ;;  %v2597_v8 = vld [vmem:[#allocation2 + $0x44] ss:$16 sps:$4 sm:$0xff]   ;;  %v2601_v10 = vld [vmem:[#allocation2 + $0x40] ss:$16 sps:$4 sm:$0xff]   ;;  %v78_v45 = vunpack.c.0.s8 %v77_v39  ;;  %v2716_v39 = vld [vmem:[#allocation2 + $0x8c] ss:$16 sps:$4 sm:$0xff]  }
  0x2c   :  { %v2599_v9 = vld [vmem:[#allocation2 + $0x244] ss:$16 sps:$4 sm:$0xff]   ;;  %v2602_v11 = vld [vmem:[#allocation2 + $0x240] ss:$16 sps:$4 sm:$0xff]  }
  0x2d   :  { %1315 = vmatpush1.bf16.msra.mxu1 %v2595_v6  ;;  %v2603_v12 = vld [vmem:[#allocation2 + $0x64] ss:$16 sps:$4 sm:$0xff]   ;;  %v2607_v14 = vld [vmem:[#allocation2 + $0x60] ss:$16 sps:$4 sm:$0xff]   ;;  %v3146_v53 = vsub.s32 %v78_v45, %v3143_v46  ;;  %v2720_v45 = vld [vmem:[#allocation2 + $0xa8] ss:$16 sps:$4 sm:$0xff]  }
  0x2e   :  { %1356 = vmatpush1.bf16.msra.mxu0 %v2596_v7  ;;  %1316 = vmatprep.subr.bf16.mxu1 %v2597_v8  ;;  %v2605_v13 = vld [vmem:[#allocation2 + $0x264] ss:$16 sps:$4 sm:$0xff]   ;;  %v2608_v15 = vld [vmem:[#allocation2 + $0x260] ss:$16 sps:$4 sm:$0xff]  }
  0x2f   :  { %1357 = vmatprep.subr.bf16.mxu0 %v2599_v9  ;;  %v2609_v16 = vld [vmem:[#allocation2 + $0x84] ss:$16 sps:$4 sm:$0xff]   ;;  %v2613_v18 = vld [vmem:[#allocation2 + $0x80] ss:$16 sps:$4 sm:$0xff]   ;;  %v103_v1 = vrot.slane %v2686_v59, %v3146_v53  ;;  %v2732_v59 = vld [vmem:[#allocation2 + $0xe8] ss:$16 sps:$4 sm:$0xff]  }
  0x30   :  { %v2611_v17 = vld [vmem:[#allocation2 + $0x284] ss:$16 sps:$4 sm:$0xff]   ;;  %v2614_v19 = vld [vmem:[#allocation2 + $0x280] ss:$16 sps:$4 sm:$0xff]  }
  0x31   :  { %1317 = vmatpush1.bf16.msra.mxu1 %v2601_v10  ;;  %v2615_v20 = vld [vmem:[#allocation2 + $0xa4] ss:$16 sps:$4 sm:$0xff]   ;;  %v2619_v22 = vld [vmem:[#allocation2 + $0xa0] ss:$16 sps:$4 sm:$0xff]  }
  0x32   :  { %1358 = vmatpush1.bf16.msra.mxu0 %v2602_v11  ;;  %1318 = vmatprep.subr.bf16.mxu1 %v2603_v12  ;;  %v2617_v21 = vld [vmem:[#allocation2 + $0x2a4] ss:$16 sps:$4 sm:$0xff]   ;;  %v2620_v23 = vld [vmem:[#allocation2 + $0x2a0] ss:$16 sps:$4 sm:$0xff]  }
  0x33   :  { %1359 = vmatprep.subr.bf16.mxu0 %v2605_v13  ;;  %v2621_v24 = vld [vmem:[#allocation2 + $0xc4] ss:$16 sps:$4 sm:$0xff]   ;;  %v2625_v26 = vld [vmem:[#allocation2 + $0xc0] ss:$16 sps:$4 sm:$0xff]  }
  0x34   :  { %v2623_v25 = vld [vmem:[#allocation2 + $0x2c4] ss:$16 sps:$4 sm:$0xff]   ;;  %v2626_v27 = vld [vmem:[#allocation2 + $0x2c0] ss:$16 sps:$4 sm:$0xff]  }
  0x35   :  { %1319 = vmatpush1.bf16.msra.mxu1 %v2607_v14  ;;  %v2627_v28 = vld [vmem:[#allocation2 + $0xe4] ss:$16 sps:$4 sm:$0xff]   ;;  %v2631_v30 = vld [vmem:[#allocation2 + $0xe0] ss:$16 sps:$4 sm:$0xff]  }
  0x36   :  { %1360 = vmatpush1.bf16.msra.mxu0 %v2608_v15  ;;  %1320 = vmatprep.subr.bf16.mxu1 %v2609_v16  ;;  %v2629_v29 = vld [vmem:[#allocation2 + $0x2e4] ss:$16 sps:$4 sm:$0xff]   ;;  %v2632_v31 = vld [vmem:[#allocation2 + $0x2e0] ss:$16 sps:$4 sm:$0xff]  }
  0x37   :  { %1361 = vmatprep.subr.bf16.mxu0 %v2611_v17  ;;  %v2633_v32 = vld [vmem:[#allocation2 + $0x104] ss:$16 sps:$4 sm:$0xff]   ;;  %v2637_v34 = vld [vmem:[#allocation2 + $0x100] ss:$16 sps:$4 sm:$0xff]  }
  0x38   :  { %v2635_v33 = vld [vmem:[#allocation2 + $0x304] ss:$16 sps:$4 sm:$0xff]   ;;  %v2638_v35 = vld [vmem:[#allocation2 + $0x300] ss:$16 sps:$4 sm:$0xff]  }
  0x39   :  { %1321 = vmatpush1.bf16.msra.mxu1 %v2613_v18  ;;  %v2639_v36 = vld [vmem:[#allocation2 + $0x124] ss:$16 sps:$4 sm:$0xff]   ;;  %v2643_v41 = vld [vmem:[#allocation2 + $0x120] ss:$16 sps:$4 sm:$0xff]  }
  0x3a   :  { %1362 = vmatpush1.bf16.msra.mxu0 %v2614_v19  ;;  %1322 = vmatprep.subr.bf16.mxu1 %v2615_v20  ;;  %v2641_v37 = vld [vmem:[#allocation2 + $0x324] ss:$16 sps:$4 sm:$0xff]   ;;  %v2644_v42 = vld [vmem:[#allocation2 + $0x320] ss:$16 sps:$4 sm:$0xff]  }
  0x3b   :  { %1363 = vmatprep.subr.bf16.mxu0 %v2617_v21  ;;  %v2645_v43 = vld [vmem:[#allocation2 + $0x144] ss:$16 sps:$4 sm:$0xff]   ;;  %v2649_v47 = vld [vmem:[#allocation2 + $0x140] ss:$16 sps:$4 sm:$0xff]   ;;  %v2692_v21 = vld [vmem:[#allocation2 + $0xc] ss:$16 sps:$4 sm:$0xff]  }
  0x3c   :  { %v2647_v44 = vld [vmem:[#allocation2 + $0x344] ss:$16 sps:$4 sm:$0xff]   ;;  %v2650_v48 = vld [vmem:[#allocation2 + $0x340] ss:$16 sps:$4 sm:$0xff]  }
  0x3d   :  { %1323 = vmatpush1.bf16.msra.mxu1 %v2619_v22  ;;  %v2651_v49 = vld [vmem:[#allocation2 + $0x164] ss:$16 sps:$4 sm:$0xff]   ;;  %v2655_v51 = vld [vmem:[#allocation2 + $0x160] ss:$16 sps:$4 sm:$0xff]  }
  0x3e   :  { %1364 = vmatpush1.bf16.msra.mxu0 %v2620_v23  ;;  %1324 = vmatprep.subr.bf16.mxu1 %v2621_v24  ;;  %v2653_v50 = vld [vmem:[#allocation2 + $0x364] ss:$16 sps:$4 sm:$0xff]   ;;  %v2656_v52 = vld [vmem:[#allocation2 + $0x360] ss:$16 sps:$4 sm:$0xff]   ;;  %v2690_v24 = vld [vmem:[#allocation2 + $0x8] ss:$16 sps:$4 sm:$0xff]  }
  0x3f   :  { %1365 = vmatprep.subr.bf16.mxu0 %v2623_v25  ;;  %v2657_v54 = vld [vmem:[#allocation2 + $0x184] ss:$16 sps:$4 sm:$0xff]   ;;  %v2681_v56 = vld [vmem:[%s3287_s0] ss:$12 sps:$4 sm:$0xff]  }
  0x40   :  { %v2659_v55 = vld [vmem:[#allocation2 + $0x384] ss:$16 sps:$4 sm:$0xff]   ;;  %v82_v60 = vrot.slane %v2681_v56, %v3146_v53  ;;  %v2661_v63 = vld [vmem:[#allocation2 + $0x180] ss:$16 sps:$4 sm:$0xff]  }
  0x41   :  { %1325 = vmatpush1.bf16.msra.mxu1 %v2625_v26  ;;  %v2683_v57 = vld [vmem:[%s3287_s0 + $0x18] ss:$12 sps:$4 sm:$0xff]   ;;  %v2662_v0 = vld [vmem:[#allocation2 + $0x380] ss:$16 sps:$4 sm:$0xff]  }
  0x42   :  { %1366 = vmatpush1.bf16.msra.mxu0 %v2626_v27  ;;  %1326 = vmatprep.subr.bf16.mxu1 %v2627_v28  ;;  %v2685_v58 = vld [vmem:[%s3287_s0 + $0x4] ss:$12 sps:$4 sm:$0xff]   ;;  %v96_v61 = vrot.slane %v2683_v57, %v3146_v53  ;;  %v2698_v27 = vld [vmem:[#allocation2 + $0x2c] ss:$16 sps:$4 sm:$0xff]  }
  0x43   :  { %1367 = vmatprep.subr.bf16.mxu0 %v2629_v29  ;;  %v89_v62 = vrot.slane %v2685_v58, %v3146_v53  ;;  %v2663_v2 = vld [vmem:[#allocation2 + $0x1a4] ss:$16 sps:$4 sm:$0xff]   ;;  %v2667_v7 = vld [vmem:[#allocation2 + $0x1a0] ss:$16 sps:$4 sm:$0xff]   ;;  %v2696_v29 = vld [vmem:[#allocation2 + $0x28] ss:$16 sps:$4 sm:$0xff]  }
  0x44   :  { %v105_v3 = vcombine.high %v82_v60, %v96_v61  ;;  %v2665_v4 = vld [vmem:[#allocation2 + $0x3a4] ss:$16 sps:$4 sm:$0xff]   ;;  %v2668_v8 = vld [vmem:[#allocation2 + $0x3a0] ss:$16 sps:$4 sm:$0xff]   ;;  %v104_v18 = vcombine.low %v82_v60, %v96_v61  ;;  %v2740_v61 = vld [vmem:[#allocation2 + $0x10c] ss:$16 sps:$4 sm:$0xff]  }
  0x45   :  { %1327 = vmatpush1.bf16.msra.mxu1 %v2631_v30  ;;  %v107_v5 = vcombine.high %v89_v62, %v103_v1  ;;  %v2669_v10 = vld [vmem:[#allocation2 + $0x1c4] ss:$16 sps:$4 sm:$0xff]   ;;  %v2673_v12 = vld [vmem:[#allocation2 + $0x1c0] ss:$16 sps:$4 sm:$0xff]   ;;  %v106_v19 = vcombine.low %v89_v62, %v103_v1  ;;  %v2738_v1 = vld [vmem:[#allocation2 + $0x108] ss:$16 sps:$4 sm:$0xff]  }
  0x46   :  { %1368 = vmatpush1.bf16.msra.mxu0 %v2632_v31  ;;  %1328 = vmatprep.subr.bf16.mxu1 %v2633_v32  ;;  %v133_v6 = vpack.c.bf16 %v105_v3, %v105_v3  ;;  %v2671_v11 = vld [vmem:[#allocation2 + $0x3c4] ss:$16 sps:$4 sm:$0xff]   ;;  %v2674_v13 = vld [vmem:[#allocation2 + $0x3c0] ss:$16 sps:$4 sm:$0xff]   ;;  %v3167_v22 = vpack.c.bf16 %v104_v18, %v104_v18  ;;  %v2704_v31 = vld [vmem:[#allocation2 + $0x4c] ss:$16 sps:$4 sm:$0xff]  }
  0x47   :  { %1369 = vmatprep.subr.bf16.mxu0 %v2635_v33  ;;  %v3164_v9 = vpack.c.bf16 %v107_v5, %v107_v5  ;;  %v2675_v14 = vld [vmem:[#allocation2 + $0x1e4] ss:$16 sps:$4 sm:$0xff]   ;;  %v2679_v16 = vld [vmem:[#allocation2 + $0x1e0] ss:$16 sps:$4 sm:$0xff]   ;;  %v3169_v25 = vpack.c.bf16 %v106_v19, %v106_v19  ;;  %v2702_v33 = vld [vmem:[#allocation2 + $0x48] ss:$16 sps:$4 sm:$0xff]  }
  0x48   :  { %1344 = vmatprep.mubr.bf16.mxu1 %v133_v6  ;;  %v2677_v15 = vld [vmem:[#allocation2 + $0x3e4] ss:$16 sps:$4 sm:$0xff]   ;;  %v2680_v17 = vld [vmem:[#allocation2 + $0x3e0] ss:$16 sps:$4 sm:$0xff]   ;;  %v2770_v19 = vld [vmem:[#allocation2 + $0x1ac] ss:$16 sps:$4 sm:$0xff]  }
  0x49   :  { %1329 = vmatpush1.bf16.msra.mxu1 %v2637_v34  ;;  %1385 = vmatprep.mubr.bf16.mxu0 %v3164_v9  ;;  %v2689_v20 = vld [vmem:[#allocation2 + $0x404] ss:$16 sps:$4 sm:$0xff]   ;;  %v2687_v23 = vld [vmem:[#allocation2 + $0x400] ss:$16 sps:$4 sm:$0xff]  }
  0x4a   :  { %1370 = vmatpush1.bf16.msra.mxu0 %v2638_v35  ;;  %1330 = vmatprep.subr.bf16.mxu1 %v2639_v36  ;;  %v2695_v26 = vld [vmem:[#allocation2 + $0x424] ss:$16 sps:$4 sm:$0xff]   ;;  %v2693_v28 = vld [vmem:[#allocation2 + $0x420] ss:$16 sps:$4 sm:$0xff]   ;;  %v2710_v35 = vld [vmem:[#allocation2 + $0x6c] ss:$16 sps:$4 sm:$0xff]  }
  0x4b   :  { %1371 = vmatprep.subr.bf16.mxu0 %v2641_v37  ;;  %v2701_v30 = vld [vmem:[#allocation2 + $0x444] ss:$16 sps:$4 sm:$0xff]   ;;  %v2699_v32 = vld [vmem:[#allocation2 + $0x440] ss:$16 sps:$4 sm:$0xff]   ;;  %v2708_v37 = vld [vmem:[#allocation2 + $0x68] ss:$16 sps:$4 sm:$0xff]  }
  0x4c   :  { %v2707_v34 = vld [vmem:[#allocation2 + $0x464] ss:$16 sps:$4 sm:$0xff]   ;;  %v2705_v36 = vld [vmem:[#allocation2 + $0x460] ss:$16 sps:$4 sm:$0xff]  }
  0x4d   :  { %1331 = vmatpush1.bf16.msra.mxu1 %v2643_v41  ;;  %v2713_v38 = vld [vmem:[#allocation2 + $0x484] ss:$16 sps:$4 sm:$0xff]   ;;  %v2711_v40 = vld [vmem:[#allocation2 + $0x480] ss:$16 sps:$4 sm:$0xff]   ;;  %v2714_v41 = vld [vmem:[#allocation2 + $0x88] ss:$16 sps:$4 sm:$0xff]  }
  0x4e   :  { %1372 = vmatpush1.bf16.msra.mxu0 %v2644_v42  ;;  %1332 = vmatprep.subr.bf16.mxu1 %v2645_v43  ;;  %v2719_v42 = vld [vmem:[#allocation2 + $0x4a4] ss:$16 sps:$4 sm:$0xff]   ;;  %v2722_v43 = vld [vmem:[#allocation2 + $0xac] ss:$16 sps:$4 sm:$0xff]   ;;  %v2729_v58 = vld [vmem:[#allocation2 + $0x4e0] ss:$16 sps:$4 sm:$0xff]  }
  0x4f   :  { %1373 = vmatprep.subr.bf16.mxu0 %v2647_v44  ;;  %v2717_v44 = vld [vmem:[#allocation2 + $0x4a0] ss:$16 sps:$4 sm:$0xff]   ;;  %v2737_v60 = vld [vmem:[#allocation2 + $0x504] ss:$16 sps:$4 sm:$0xff]  }
  0x50   :  { %v2741_v3 = vld [vmem:[#allocation2 + $0x520] ss:$16 sps:$4 sm:$0xff]   ;;  %v2749_v5 = vld [vmem:[#allocation2 + $0x544] ss:$16 sps:$4 sm:$0xff]  }
  0x51   :  { %1333 = vmatpush1.bf16.msra.mxu1 %v2649_v47  ;;  %v2725_v47 = vld [vmem:[#allocation2 + $0x4c4] ss:$16 sps:$4 sm:$0xff]  }
  0x52   :  { %1374 = vmatpush1.bf16.msra.mxu0 %v2650_v48  ;;  %1334 = vmatprep.subr.bf16.mxu1 %v2651_v49  ;;  %v2728_v48 = vld [vmem:[#allocation2 + $0xcc] ss:$16 sps:$4 sm:$0xff]   ;;  %v2723_v49 = vld [vmem:[#allocation2 + $0x4c0] ss:$16 sps:$4 sm:$0xff]   ;;  %v2767_v18 = vld [vmem:[#allocation2 + $0x5a4] ss:$16 sps:$4 sm:$0xff]  }
  0x53   :  { %1375 = vmatprep.subr.bf16.mxu0 %v2653_v50  ;;  %v2726_v50 = vld [vmem:[#allocation2 + $0xc8] ss:$16 sps:$4 sm:$0xff]  }
  0x55   :  { %1335 = vmatpush1.bf16.msra.mxu1 %v2655_v51  ;;  %v2731_v51 = vld [vmem:[#allocation2 + $0x4e4] ss:$16 sps:$4 sm:$0xff]  }
  0x56   :  { %1376 = vmatpush1.bf16.msra.mxu0 %v2656_v52  ;;  %1336 = vmatprep.subr.bf16.mxu1 %v2657_v54  ;;  %v2734_v52 = vld [vmem:[#allocation2 + $0xec] ss:$16 sps:$4 sm:$0xff]   ;;  %v2783_v54 = vld [vmem:[%s3287_s0 + $0x8] ss:$12 sps:$4 sm:$0xff]  }
  0x57   :  { %1377 = vmatprep.subr.bf16.mxu0 %v2659_v55  ;;  %v2784_v55 = vld [vmem:[%s3287_s0 + $0x20] ss:$12 sps:$4 sm:$0xff]   ;;  %v3180_v56 = vrot.slane %v2783_v54, %v3146_v53 }
  0x58   :  { %v3183_v57 = vrot.slane %v2784_v55, %v3146_v53  ;;  %v2743_v53 = vld [vmem:[#allocation2 + $0x524] ss:$16 sps:$4 sm:$0xff]   ;;  %v2811_v54 = vld [vmem:[#allocation2 + $0x30c] ss:$16 sps:$4 sm:$0xff]  }
  0x59   :  { %1337 = vmatpush1.bf16.msra.mxu1 %v2661_v63  ;;  %v2889_v55 = vld [vmem:[#allocation5 + $0x24] ss:$8 sps:$4 sm:$0xff]  }
  0x5a   :  { %1378 = vmatpush1.bf16.msra.mxu0 %v2662_v0  ;;  %1338 = vmatprep.subr.bf16.mxu1 %v2663_v2  ;;  %v125_v62 = vcombine.high %v3180_v56, %v3183_v57  ;;  %v2735_v0 = vld [vmem:[#allocation2 + $0x500] ss:$16 sps:$4 sm:$0xff]   ;;  %v2746_v2 = vld [vmem:[#allocation2 + $0x12c] ss:$16 sps:$4 sm:$0xff]  }
  0x5b   :  { %1379 = vmatprep.subr.bf16.mxu0 %v2665_v4  ;;  %v2744_v4 = vld [vmem:[#allocation2 + $0x128] ss:$16 sps:$4 sm:$0xff]  }
  0x5c   :  { %v3187_v63 = vpack.c.bf16 %v125_v62, %v125_v62  ;;  %v2817_v62 = vld [vmem:[#allocation2 + $0x34c] ss:$16 sps:$4 sm:$0xff]  }
  0x5d   :  { %1339 = vmatpush1.bf16.msra.mxu1 %v2667_v7  ;;  %v2747_v7 = vld [vmem:[#allocation2 + $0x540] ss:$16 sps:$4 sm:$0xff]  }
  0x5e   :  { %1380 = vmatpush1.bf16.msra.mxu0 %v2668_v8  ;;  %1340 = vmatprep.subr.bf16.mxu1 %v2669_v10  ;;  %v2750_v8 = vld [vmem:[#allocation2 + $0x148] ss:$16 sps:$4 sm:$0xff]   ;;  %v2755_v10 = vld [vmem:[#allocation2 + $0x564] ss:$16 sps:$4 sm:$0xff]  }
  0x5f   :  { %1381 = vmatprep.subr.bf16.mxu0 %v2671_v11  ;;  %v2758_v11 = vld [vmem:[#allocation2 + $0x16c] ss:$16 sps:$4 sm:$0xff]  }
  0x61   :  { %1341 = vmatpush1.bf16.msra.mxu1 %v2673_v12  ;;  %v2753_v12 = vld [vmem:[#allocation2 + $0x560] ss:$16 sps:$4 sm:$0xff]  }
  0x62   :  { %1382 = vmatpush1.bf16.msra.mxu0 %v2674_v13  ;;  %1342 = vmatprep.subr.bf16.mxu1 %v2675_v14  ;;  %v2756_v13 = vld [vmem:[#allocation2 + $0x168] ss:$16 sps:$4 sm:$0xff]   ;;  %v2761_v14 = vld [vmem:[#allocation2 + $0x584] ss:$16 sps:$4 sm:$0xff]  }
  0x63   :  { %1383 = vmatprep.subr.bf16.mxu0 %v2677_v15  ;;  %v2764_v15 = vld [vmem:[#allocation2 + $0x18c] ss:$16 sps:$4 sm:$0xff]  }
  0x65   :  { %1343 = vmatpush1.bf16.msra.mxu1 %v2679_v16  ;;  %v2759_v16 = vld [vmem:[#allocation2 + $0x580] ss:$16 sps:$4 sm:$0xff]  }
  0x66   :  { %1384 = vmatpush1.bf16.msra.mxu0 %v2680_v17  ;;  %1435 = vmatprep.subr.bf16.mxu1 %v2692_v21  ;;  %v2762_v17 = vld [vmem:[#allocation2 + $0x188] ss:$16 sps:$4 sm:$0xff]  }
  0x67   :  { %1394 = vmatprep.subr.bf16.mxu0 %v2689_v20  ;;  %v2765_v20 = vld [vmem:[#allocation2 + $0x5a0] ss:$16 sps:$4 sm:$0xff]   ;;  %v2768_v21 = vld [vmem:[#allocation2 + $0x1a8] ss:$16 sps:$4 sm:$0xff]  }
  0x68   :  { %1345 = vmatmul.mubr.bf16.vlgmr.msra.gmra.mrb[0].mxu1 %v3167_v22 }
  0x69   :  { %1386 = vmatmul.mubr.bf16.vlgmr.msra.gmra.mrb[0].mxu0 %v3169_v25  ;;  %1436 = vmatpush1.bf16.msra.mxu1 %v2690_v24  ;;  %v2776_v24 = vld [vmem:[#allocation2 + $0x1cc] ss:$16 sps:$4 sm:$0xff]  }
  0x6a   :  { %1395 = vmatpush1.bf16.msra.mxu0 %v2687_v23  ;;  %1437 = vmatprep.subr.bf16.mxu1 %v2698_v27  ;;  %v2773_v23 = vld [vmem:[#allocation2 + $0x5c4] ss:$16 sps:$4 sm:$0xff]   ;;  %v2774_v27 = vld [vmem:[#allocation2 + $0x1c8] ss:$16 sps:$4 sm:$0xff]  }
  0x6b   :  { %1396 = vmatprep.subr.bf16.mxu0 %v2695_v26  ;;  %1467 = vmatprep.mubr.bf16.mxu1 %v133_v6  ;;  %v2752_v6 = vld [vmem:[#allocation2 + $0x14c] ss:$16 sps:$4 sm:$0xff]   ;;  %v2771_v26 = vld [vmem:[#allocation2 + $0x5c0] ss:$16 sps:$4 sm:$0xff]  }
  0x6c   :  { %1426 = vmatprep.mubr.bf16.mxu0 %v3187_v63 }
  0x6d   :  { %1438 = vmatpush1.bf16.msra.mxu1 %v2696_v29  ;;  %v2782_v29 = vld [vmem:[#allocation2 + $0x1ec] ss:$16 sps:$4 sm:$0xff]  }
  0x6e   :  { %1397 = vmatpush1.bf16.msra.mxu0 %v2693_v28  ;;  %1439 = vmatprep.subr.bf16.mxu1 %v2704_v31  ;;  %v2779_v28 = vld [vmem:[#allocation2 + $0x5e4] ss:$16 sps:$4 sm:$0xff]   ;;  %v2777_v31 = vld [vmem:[#allocation2 + $0x5e0] ss:$16 sps:$4 sm:$0xff]  }
  0x6f   :  { %1398 = vmatprep.subr.bf16.mxu0 %v2701_v30  ;;  %v124_v30 = vcombine.low %v3180_v56, %v3183_v57  ;;  %v2809_v56 = vld [vmem:[#allocation2 + $0x308] ss:$16 sps:$4 sm:$0xff]  }
  0x70   :  { %v2887_v57 = vld [vmem:[#allocation5 + $0x20] ss:$8 sps:$4 sm:$0xff]  }
  0x71   :  { %1440 = vmatpush1.bf16.msra.mxu1 %v2702_v33  ;;  %v2787_v33 = vld [vmem:[#allocation2 + $0x20c] ss:$16 sps:$4 sm:$0xff]  }
  0x72   :  { %1399 = vmatpush1.bf16.msra.mxu0 %v2699_v32  ;;  %1441 = vmatprep.subr.bf16.mxu1 %v2710_v35  ;;  %v2780_v32 = vld [vmem:[#allocation2 + $0x1e8] ss:$16 sps:$4 sm:$0xff]  }
  0x73   :  { %1400 = vmatprep.subr.bf16.mxu0 %v2707_v34  ;;  %v3192_v34 = vpack.c.bf16 %v124_v30, %v124_v30  ;;  %v2785_v35 = vld [vmem:[#allocation2 + $0x208] ss:$16 sps:$4 sm:$0xff]   ;;  %v2916_v30 = vld [vmem:[#allocation5 + $0xb4] ss:$8 sps:$4 sm:$0xff]  }
  0x75   :  { %1442 = vmatpush1.bf16.msra.mxu1 %v2708_v37  ;;  %v2788_v37 = vld [vmem:[#allocation2 + $0x228] ss:$16 sps:$4 sm:$0xff]  }
  0x76   :  { %1401 = vmatpush1.bf16.msra.mxu0 %v2705_v36  ;;  %1443 = vmatprep.subr.bf16.mxu1 %v2716_v39  ;;  %v2790_v36 = vld [vmem:[#allocation2 + $0x22c] ss:$16 sps:$4 sm:$0xff]   ;;  %v2791_v39 = vld [vmem:[#allocation2 + $0x248] ss:$16 sps:$4 sm:$0xff]  }
  0x77   :  { %1402 = vmatprep.subr.bf16.mxu0 %v2713_v38  ;;  %v2793_v38 = vld [vmem:[#allocation2 + $0x24c] ss:$16 sps:$4 sm:$0xff]  }
  0x79   :  { %1444 = vmatpush1.bf16.msra.mxu1 %v2714_v41  ;;  %v2794_v41 = vld [vmem:[#allocation2 + $0x268] ss:$16 sps:$4 sm:$0xff]  }
  0x7a   :  { %1403 = vmatpush1.bf16.msra.mxu0 %v2711_v40  ;;  %1445 = vmatprep.subr.bf16.mxu1 %v2722_v43  ;;  %v2796_v40 = vld [vmem:[#allocation2 + $0x26c] ss:$16 sps:$4 sm:$0xff]   ;;  %v2797_v43 = vld [vmem:[#allocation2 + $0x288] ss:$16 sps:$4 sm:$0xff]  }
  0x7b   :  { %1404 = vmatprep.subr.bf16.mxu0 %v2719_v42  ;;  %v2799_v42 = vld [vmem:[#allocation2 + $0x28c] ss:$16 sps:$4 sm:$0xff]  }
  0x7d   :  { %1446 = vmatpush1.bf16.msra.mxu1 %v2720_v45  ;;  %v2800_v45 = vld [vmem:[#allocation2 + $0x2a8] ss:$16 sps:$4 sm:$0xff]  }
  0x7e   :  { %1405 = vmatpush1.bf16.msra.mxu0 %v2717_v44  ;;  %1447 = vmatprep.subr.bf16.mxu1 %v2728_v48  ;;  %v2802_v44 = vld [vmem:[#allocation2 + $0x2ac] ss:$16 sps:$4 sm:$0xff]   ;;  %v2881_v48 = vld [vmem:[#allocation5] ss:$8 sps:$4 sm:$0xff]  }
  0x7f   :  { %1406 = vmatprep.subr.bf16.mxu0 %v2725_v47  ;;  %v2803_v47 = vld [vmem:[#allocation2 + $0x2c8] ss:$16 sps:$4 sm:$0xff]  }
  0x81   :  { %1448 = vmatpush1.bf16.msra.mxu1 %v2726_v50  ;;  %v2886_v50 = vld [vmem:[#allocation5 + $0x14] ss:$8 sps:$4 sm:$0xff]  }
  0x82   :  { %1407 = vmatpush1.bf16.msra.mxu0 %v2723_v49  ;;  %1449 = vmatprep.subr.bf16.mxu1 %v2734_v52  ;;  %v2883_v49 = vld [vmem:[#allocation5 + $0x4] ss:$8 sps:$4 sm:$0xff]   ;;  %v2884_v52 = vld [vmem:[#allocation5 + $0x10] ss:$8 sps:$4 sm:$0xff]  }
  0x83   :  { %1408 = vmatprep.subr.bf16.mxu0 %v2731_v51  ;;  %v2806_v51 = vld [vmem:[#allocation2 + $0x2e8] ss:$16 sps:$4 sm:$0xff]  }
  0x85   :  { %1450 = vmatpush1.bf16.msra.mxu1 %v2732_v59  ;;  %v2892_v59 = vld [vmem:[#allocation5 + $0x34] ss:$8 sps:$4 sm:$0xff]  }
  0x86   :  { %1409 = vmatpush1.bf16.msra.mxu0 %v2729_v58  ;;  %1451 = vmatprep.subr.bf16.mxu1 %v2740_v61  ;;  %v2814_v58 = vld [vmem:[#allocation2 + $0x32c] ss:$16 sps:$4 sm:$0xff]   ;;  %v2890_v61 = vld [vmem:[#allocation5 + $0x30] ss:$8 sps:$4 sm:$0xff]  }
  0x87   :  { %1410 = vmatprep.subr.bf16.mxu0 %v2737_v60  ;;  %v2812_v60 = vld [vmem:[#allocation2 + $0x328] ss:$16 sps:$4 sm:$0xff]  }
  0x89   :  { %1452 = vmatpush1.bf16.msra.mxu1 %v2738_v1  ;;  %v2815_v1 = vld [vmem:[#allocation2 + $0x348] ss:$16 sps:$4 sm:$0xff]  }
  0x8a   :  { %1411 = vmatpush1.bf16.msra.mxu0 %v2735_v0  ;;  %1453 = vmatprep.subr.bf16.mxu1 %v2746_v2  ;;  %v2895_v0 = vld [vmem:[#allocation5 + $0x44] ss:$8 sps:$4 sm:$0xff]  }
  0x8b   :  { %1412 = vmatprep.subr.bf16.mxu0 %v2743_v53  ;;  %v2893_v53 = vld [vmem:[#allocation5 + $0x40] ss:$8 sps:$4 sm:$0xff]   ;;  %v2820_v2 = vld [vmem:[#allocation2 + $0x36c] ss:$16 sps:$4 sm:$0xff]  }
  0x8d   :  { %1454 = vmatpush1.bf16.msra.mxu1 %v2744_v4  ;;  %v2818_v4 = vld [vmem:[#allocation2 + $0x368] ss:$16 sps:$4 sm:$0xff]  }
  0x8e   :  { %1413 = vmatpush1.bf16.msra.mxu0 %v2741_v3  ;;  %1455 = vmatprep.subr.bf16.mxu1 %v2752_v6  ;;  %v2898_v3 = vld [vmem:[#allocation5 + $0x54] ss:$8 sps:$4 sm:$0xff]  }
  0x8f   :  { %1414 = vmatprep.subr.bf16.mxu0 %v2749_v5  ;;  %v2896_v5 = vld [vmem:[#allocation5 + $0x50] ss:$8 sps:$4 sm:$0xff]   ;;  %v2823_v6 = vld [vmem:[#allocation2 + $0x38c] ss:$16 sps:$4 sm:$0xff]  }
  0x91   :  { %1456 = vmatpush1.bf16.msra.mxu1 %v2750_v8  ;;  %v2821_v8 = vld [vmem:[#allocation2 + $0x388] ss:$16 sps:$4 sm:$0xff]  }
  0x92   :  { %1415 = vmatpush1.bf16.msra.mxu0 %v2747_v7  ;;  %1457 = vmatprep.subr.bf16.mxu1 %v2758_v11  ;;  %v2901_v7 = vld [vmem:[#allocation5 + $0x64] ss:$8 sps:$4 sm:$0xff]  }
  0x93   :  { %1416 = vmatprep.subr.bf16.mxu0 %v2755_v10  ;;  %v2899_v10 = vld [vmem:[#allocation5 + $0x60] ss:$8 sps:$4 sm:$0xff]   ;;  %v2826_v11 = vld [vmem:[#allocation2 + $0x3ac] ss:$16 sps:$4 sm:$0xff]  }
  0x95   :  { %1458 = vmatpush1.bf16.msra.mxu1 %v2756_v13  ;;  %v2824_v13 = vld [vmem:[#allocation2 + $0x3a8] ss:$16 sps:$4 sm:$0xff]  }
  0x96   :  { %1417 = vmatpush1.bf16.msra.mxu0 %v2753_v12  ;;  %1459 = vmatprep.subr.bf16.mxu1 %v2764_v15  ;;  %v2904_v12 = vld [vmem:[#allocation5 + $0x74] ss:$8 sps:$4 sm:$0xff]  }
  0x97   :  { %1418 = vmatprep.subr.bf16.mxu0 %v2761_v14  ;;  %v2902_v14 = vld [vmem:[#allocation5 + $0x70] ss:$8 sps:$4 sm:$0xff]   ;;  %v2829_v15 = vld [vmem:[#allocation2 + $0x3cc] ss:$16 sps:$4 sm:$0xff]  }
  0x99   :  { %1460 = vmatpush1.bf16.msra.mxu1 %v2762_v17  ;;  %v2827_v17 = vld [vmem:[#allocation2 + $0x3c8] ss:$16 sps:$4 sm:$0xff]  }
  0x9a   :  { %1419 = vmatpush1.bf16.msra.mxu0 %v2759_v16  ;;  %1461 = vmatprep.subr.bf16.mxu1 %v2770_v19  ;;  %v2907_v16 = vld [vmem:[#allocation5 + $0x84] ss:$8 sps:$4 sm:$0xff]  }
  0x9b   :  { %1420 = vmatprep.subr.bf16.mxu0 %v2767_v18  ;;  %v2905_v18 = vld [vmem:[#allocation5 + $0x80] ss:$8 sps:$4 sm:$0xff]   ;;  %v2832_v19 = vld [vmem:[#allocation2 + $0x3ec] ss:$16 sps:$4 sm:$0xff]  }
  0x9d   :  { %1462 = vmatpush1.bf16.msra.mxu1 %v2768_v21  ;;  %v2830_v21 = vld [vmem:[#allocation2 + $0x3e8] ss:$16 sps:$4 sm:$0xff]  }
  0x9e   :  { %1421 = vmatpush1.bf16.msra.mxu0 %v2765_v20  ;;  %1463 = vmatprep.subr.bf16.mxu1 %v2776_v24  ;;  %v2910_v20 = vld [vmem:[#allocation5 + $0x94] ss:$8 sps:$4 sm:$0xff]  }
  0x9f   :  { %1422 = vmatprep.subr.bf16.mxu0 %v2773_v23  ;;  %v2908_v23 = vld [vmem:[#allocation5 + $0x90] ss:$8 sps:$4 sm:$0xff]   ;;  %v2835_v24 = vld [vmem:[#allocation2 + $0x40c] ss:$16 sps:$4 sm:$0xff]  }
  0xa1   :  { %1464 = vmatpush1.bf16.msra.mxu1 %v2774_v27  ;;  %v2833_v27 = vld [vmem:[#allocation2 + $0x408] ss:$16 sps:$4 sm:$0xff]  }
  0xa2   :  { %1423 = vmatpush1.bf16.msra.mxu0 %v2771_v26  ;;  %1465 = vmatprep.subr.bf16.mxu1 %v2782_v29  ;;  %v2913_v26 = vld [vmem:[#allocation5 + $0xa4] ss:$8 sps:$4 sm:$0xff]   ;;  %v2911_v29 = vld [vmem:[#allocation5 + $0xa0] ss:$8 sps:$4 sm:$0xff]  }
  0xa3   :  { %1424 = vmatprep.subr.bf16.mxu0 %v2779_v28  ;;  %v2838_v28 = vld [vmem:[#allocation2 + $0x42c] ss:$16 sps:$4 sm:$0xff]  }
  0xa5   :  { %1466 = vmatpush1.bf16.msra.mxu1 %v2780_v32  ;;  %v2841_v32 = vld [vmem:[#allocation2 + $0x44c] ss:$16 sps:$4 sm:$0xff]  }
  0xa6   :  { %1425 = vmatpush1.bf16.msra.mxu0 %v2777_v31  ;;  %1476 = vmatprep.subr.bf16.mxu1 %v2787_v33  ;;  %v2836_v31 = vld [vmem:[#allocation2 + $0x428] ss:$16 sps:$4 sm:$0xff]  }
  0xa7   :  { %1966 = vmatprep.subr.bf16.mxu0 %v2883_v49  ;;  %v2914_v33 = vld [vmem:[#allocation5 + $0xb0] ss:$8 sps:$4 sm:$0xff]  }
  0xa8   :  { %1468 = vmatmul.mubr.bf16.vlgmr.msra.gmra.mrb[4].mxu1 %v3167_v22  ;;  %v2805_v22 = vld [vmem:[#allocation2 + $0x2cc] ss:$16 sps:$4 sm:$0xff]   ;;  %v2854_v49 = vld [vmem:[#allocation2 + $0x4e8] ss:$16 sps:$4 sm:$0xff]  }
  0xa9   :  { %1427 = vmatmul.mubr.bf16.vlgmr.msra.gmra.mrb[0].mxu0 %v3192_v34  ;;  %1477 = vmatpush1.bf16.msra.mxu1 %v2785_v35  ;;  %v2919_v35 = vld [vmem:[#allocation5 + $0xc4] ss:$8 sps:$4 sm:$0xff]  }
  0xaa   :  { %1508 = vmatprep.mubr.bf16.mxu1 %v3164_v9  ;;  %1478 = vmatprep.subr.bf16.mxu1 %v2790_v36  ;;  %v2808_v9 = vld [vmem:[#allocation2 + $0x2ec] ss:$16 sps:$4 sm:$0xff]   ;;  %v2839_v36 = vld [vmem:[#allocation2 + $0x448] ss:$16 sps:$4 sm:$0xff]  }
  0xab   :  { %1967 = vmatpush1.bf16.msra.mxu0 %v2881_v48  ;;  %v2928_v48 = vld [vmem:[#allocation5 + $0xf4] ss:$8 sps:$4 sm:$0xff]  }
  0xac   :  { %1968 = vmatprep.subr.bf16.mxu0 %v2886_v50  ;;  %v2926_v50 = vld [vmem:[#allocation5 + $0xf0] ss:$8 sps:$4 sm:$0xff]  }
  0xad   :  { %1479 = vmatpush1.bf16.msra.mxu1 %v2788_v37  ;;  %v2844_v37 = vld [vmem:[#allocation2 + $0x46c] ss:$16 sps:$4 sm:$0xff]  }
  0xae   :  { %1480 = vmatprep.subr.bf16.mxu1 %v2793_v38  ;;  %v2917_v38 = vld [vmem:[#allocation5 + $0xc0] ss:$8 sps:$4 sm:$0xff]  }
  0xaf   :  { %1969 = vmatpush1.bf16.msra.mxu0 %v2884_v52  ;;  %v2857_v52 = vld [vmem:[#allocation2 + $0x508] ss:$16 sps:$4 sm:$0xff]  }
  0xb0   :  { %1970 = vmatprep.subr.bf16.mxu0 %v2889_v55  ;;  %v2931_v55 = vld [vmem:[#allocation5 + $0x104] ss:$8 sps:$4 sm:$0xff]  }
  0xb1   :  { %1481 = vmatpush1.bf16.msra.mxu1 %v2791_v39  ;;  %v2922_v39 = vld [vmem:[#allocation5 + $0xd4] ss:$8 sps:$4 sm:$0xff]  }
  0xb2   :  { %1482 = vmatprep.subr.bf16.mxu1 %v2796_v40  ;;  %v2847_v40 = vld [vmem:[#allocation2 + $0x48c] ss:$16 sps:$4 sm:$0xff]  }
  0xb3   :  { %1971 = vmatpush1.bf16.msra.mxu0 %v2887_v57  ;;  %v2865_v57 = vld [vmem:[#allocation2 + $0x54c] ss:$16 sps:$4 sm:$0xff]  }
  0xb4   :  { %1972 = vmatprep.subr.bf16.mxu0 %v2892_v59  ;;  %v2868_v59 = vld [vmem:[#allocation2 + $0x56c] ss:$16 sps:$4 sm:$0xff]  }
  0xb5   :  { %1483 = vmatpush1.bf16.msra.mxu1 %v2794_v41  ;;  %v2845_v41 = vld [vmem:[#allocation2 + $0x488] ss:$16 sps:$4 sm:$0xff]  }
  0xb6   :  { %1484 = vmatprep.subr.bf16.mxu1 %v2799_v42  ;;  %v2850_v42 = vld [vmem:[#allocation2 + $0x4ac] ss:$16 sps:$4 sm:$0xff]  }
  0xb7   :  { %1973 = vmatpush1.bf16.msra.mxu0 %v2890_v61  ;;  %v2871_v61 = vld [vmem:[#allocation2 + $0x58c] ss:$16 sps:$4 sm:$0xff]  }
  0xb8   :  { %1974 = vmatprep.subr.bf16.mxu0 %v2895_v0  ;;  %v2874_v0 = vld [vmem:[#allocation2 + $0x5ac] ss:$16 sps:$4 sm:$0xff]  }
  0xb9   :  { %1485 = vmatpush1.bf16.msra.mxu1 %v2797_v43  ;;  %v2848_v43 = vld [vmem:[#allocation2 + $0x4a8] ss:$16 sps:$4 sm:$0xff]  }
  0xba   :  { %1486 = vmatprep.subr.bf16.mxu1 %v2802_v44  ;;  %v2853_v44 = vld [vmem:[#allocation2 + $0x4cc] ss:$16 sps:$4 sm:$0xff]  }
  0xbb   :  { %1975 = vmatpush1.bf16.msra.mxu0 %v2893_v53  ;;  %v2877_v53 = vld [vmem:[#allocation2 + $0x5cc] ss:$16 sps:$4 sm:$0xff]  }
  0xbc   :  { %1976 = vmatprep.subr.bf16.mxu0 %v2898_v3  ;;  %v2880_v3 = vld [vmem:[#allocation2 + $0x5ec] ss:$16 sps:$4 sm:$0xff]  }
  0xbd   :  { %1487 = vmatpush1.bf16.msra.mxu1 %v2800_v45  ;;  %v2925_v45 = vld [vmem:[#allocation5 + $0xe4] ss:$8 sps:$4 sm:$0xff]  }
  0xbe   :  { %1488 = vmatprep.subr.bf16.mxu1 %v2805_v22  ;;  %v2851_v22 = vld [vmem:[#allocation2 + $0x4c8] ss:$16 sps:$4 sm:$0xff]  }
  0xbf   :  { %1977 = vmatpush1.bf16.msra.mxu0 %v2896_v5 }
  0xc0   :  { %1978 = vmatprep.subr.bf16.mxu0 %v2901_v7 }
  0xc1   :  { %1489 = vmatpush1.bf16.msra.mxu1 %v2803_v47  ;;  %v2923_v47 = vld [vmem:[#allocation5 + $0xe0] ss:$8 sps:$4 sm:$0xff]  }
  0xc2   :  { %1490 = vmatprep.subr.bf16.mxu1 %v2808_v9  ;;  %v2856_v9 = vld [vmem:[#allocation2 + $0x4ec] ss:$16 sps:$4 sm:$0xff]  }
  0xc3   :  { %1979 = vmatpush1.bf16.msra.mxu0 %v2899_v10  ;;  %v334_v10 = vsub.s32 0, %v3143_v46 }
  0xc4   :  { %1980 = vmatprep.subr.bf16.mxu0 %v2904_v12  ;;  %v338_v12 = vsub.s32 1, %v3143_v46 }
  0xc5   :  { %1491 = vmatpush1.bf16.msra.mxu1 %v2806_v51  ;;  %v2859_v51 = vld [vmem:[#allocation2 + $0x50c] ss:$16 sps:$4 sm:$0xff]  }
  0xc6   :  { %1492 = vmatprep.subr.bf16.mxu1 %v2811_v54  ;;  %v2862_v54 = vld [vmem:[#allocation2 + $0x52c] ss:$16 sps:$4 sm:$0xff]  }
  0xc7   :  { %1981 = vmatpush1.bf16.msra.mxu0 %v2902_v14 }
  0xc8   :  { %1982 = vmatprep.subr.bf16.mxu0 %v2907_v16 }
  0xc9   :  { %1493 = vmatpush1.bf16.msra.mxu1 %v2809_v56  ;;  %v2860_v56 = vld [vmem:[#allocation2 + $0x528] ss:$16 sps:$4 sm:$0xff]  }
  0xca   :  { %1494 = vmatprep.subr.bf16.mxu1 %v2814_v58  ;;  %v2863_v58 = vld [vmem:[#allocation2 + $0x548] ss:$16 sps:$4 sm:$0xff]  }
  0xcb   :  { %1983 = vmatpush1.bf16.msra.mxu0 %v2905_v18 }
  0xcc   :  { %1984 = vmatprep.subr.bf16.mxu0 %v2910_v20 }
  0xcd   :  { %1495 = vmatpush1.bf16.msra.mxu1 %v2812_v60  ;;  %v2866_v60 = vld [vmem:[#allocation2 + $0x568] ss:$16 sps:$4 sm:$0xff]  }
  0xce   :  { %1496 = vmatprep.subr.bf16.mxu1 %v2817_v62  ;;  %v2869_v62 = vld [vmem:[#allocation2 + $0x588] ss:$16 sps:$4 sm:$0xff]  }
  0xcf   :  { %1985 = vmatpush1.bf16.msra.mxu0 %v2908_v23 }
  0xd0   :  { %1986 = vmatprep.subr.bf16.mxu0 %v2913_v26 }
  0xd1   :  { %1497 = vmatpush1.bf16.msra.mxu1 %v2815_v1  ;;  %v2872_v1 = vld [vmem:[#allocation2 + $0x5a8] ss:$16 sps:$4 sm:$0xff]  }
  0xd2   :  { %1498 = vmatprep.subr.bf16.mxu1 %v2820_v2  ;;  %v2875_v2 = vld [vmem:[#allocation2 + $0x5c8] ss:$16 sps:$4 sm:$0xff]  }
  0xd3   :  { %1987 = vmatpush1.bf16.msra.mxu0 %v2911_v29  ;;  %v2929_v29 = vld [vmem:[#allocation5 + $0x100] ss:$8 sps:$4 sm:$0xff]  }
  0xd4   :  { %1988 = vmatprep.subr.bf16.mxu0 %v2916_v30 }
  0xd5   :  { %1499 = vmatpush1.bf16.msra.mxu1 %v2818_v4  ;;  %v2878_v4 = vld [vmem:[#allocation2 + $0x5e8] ss:$16 sps:$4 sm:$0xff]  }
  0xd6   :  { %1500 = vmatprep.subr.bf16.mxu1 %v2823_v6 }
  0xd7   :  { %1989 = vmatpush1.bf16.msra.mxu0 %v2914_v33  ;;  %v2978_v33 = vld [vmem:[%s3292_s5] sm:$0xff]  }
  0xd8   :  { %1990 = vmatprep.subr.bf16.mxu0 %v2919_v35  ;;  %v2979_v35 = vld [vmem:[%s3292_s5 + $0x48] sm:$0xff]  }
  0xd9   :  { %1501 = vmatpush1.bf16.msra.mxu1 %v2821_v8 }
  0xda   :  { %1502 = vmatprep.subr.bf16.mxu1 %v2826_v11  ;;  %v3204_v11 = vld [vmem:[%s3289_s2] sm:$0xf] }
  0xdb   :  { %1991 = vmatpush1.bf16.msra.mxu0 %v2917_v38  ;;  %v2980_v38 = vld [vmem:[%s3292_s5 + $0x8] sm:$0xff]  }
  0xdc   :  { %1992 = vmatprep.subr.bf16.mxu0 %v2922_v39  ;;  %v2981_v39 = vld [vmem:[%s3292_s5 + $0x50] sm:$0xff]  }
  0xdd   :  { %1503 = vmatpush1.bf16.msra.mxu1 %v2824_v13  ;;  %v335_v13 = vrot.slane %v3204_v11, %v334_v10 }
  0xde   :  { %1504 = vmatprep.subr.bf16.mxu1 %v2829_v15 }
  0xe1   :  { %1505 = vmatpush1.bf16.msra.mxu1 %v2827_v17 }
  0xe2   :  { %1506 = vmatprep.subr.bf16.mxu1 %v2832_v19 }
  0xe5   :  { %1507 = vmatpush1.bf16.msra.mxu1 %v2830_v21 }
  0xe6   :  { %1517 = vmatprep.subr.bf16.mxu1 %v2835_v24 }
  0xe8   :  { %1509 = vmatmul.mubr.bf16.vlgmr.msra.gmra.mrb[4].mxu1 %v3169_v25  ;;  %v2842_v25 = vld [vmem:[#allocation2 + $0x468] ss:$16 sps:$4 sm:$0xff]  }
  0xe9   :  { %1518 = vmatpush1.bf16.msra.mxu1 %v2833_v27  ;;  %1549 = vmatprep.mubr.bf16.mxu1 %v3187_v63  ;;  %v2920_v63 = vld [vmem:[#allocation5 + $0xd0] ss:$8 sps:$4 sm:$0xff]  }
  0xea   :  { %1519 = vmatprep.subr.bf16.mxu1 %v2838_v28  ;;  %1993 = vmatpush1.bf16.msra.mxu0 %v2920_v63  ;;  %v2982_v63 = vld [vmem:[%s3292_s5 + $0x10] sm:$0xff]  }
  0xeb   :  { %1994 = vmatprep.subr.bf16.mxu0 %v2925_v45  ;;  %v2985_v45 = vld [vmem:[%s3292_s5 + $0x60] sm:$0xff]  }
  0xed   :  { %1520 = vmatpush1.bf16.msra.mxu1 %v2836_v31  ;;  %v2934_v31 = vld [vmem:[#allocation5 + $0x114] ss:$8 sps:$4 sm:$0xff]  }
  0xee   :  { %1521 = vmatprep.subr.bf16.mxu1 %v2841_v32  ;;  %1995 = vmatpush1.bf16.msra.mxu0 %v2923_v47  ;;  %v2977_v32 = vld [vmem:[%s3292_s5 + $0x40] sm:$0xff]   ;;  %v2946_v47 = vld [vmem:[#allocation5 + $0x154] ss:$8 sps:$4 sm:$0xff]  }
  0xef   :  { %1996 = vmatprep.subr.bf16.mxu0 %v2928_v48  ;;  %v2987_v48 = vld [vmem:[%s3292_s5 + $0x68] sm:$0xff]  }
  0xf1   :  { %1522 = vmatpush1.bf16.msra.mxu1 %v2839_v36  ;;  %v2932_v36 = vld [vmem:[#allocation5 + $0x110] ss:$8 sps:$4 sm:$0xff]  }
  0xf2   :  { %1523 = vmatprep.subr.bf16.mxu1 %v2844_v37  ;;  %1997 = vmatpush1.bf16.msra.mxu0 %v2926_v50  ;;  %v2937_v37 = vld [vmem:[#allocation5 + $0x124] ss:$8 sps:$4 sm:$0xff]  }
  0xf3   :  { %2007 = vmatprep.subr.bf16.mxu0 %v2931_v55  ;;  %v2949_v50 = vld [vmem:[#allocation5 + $0x164] ss:$8 sps:$4 sm:$0xff]  }
  0xf4   :  { %v2955_v55 = vld [vmem:[#allocation5 + $0x184] ss:$8 sps:$4 sm:$0xff]  }
  0xf5   :  { %1524 = vmatpush1.bf16.msra.mxu1 %v2842_v25  ;;  %v2935_v25 = vld [vmem:[#allocation5 + $0x120] ss:$8 sps:$4 sm:$0xff]  }
  0xf6   :  { %1525 = vmatprep.subr.bf16.mxu1 %v2847_v40  ;;  %v2940_v40 = vld [vmem:[#allocation5 + $0x134] ss:$8 sps:$4 sm:$0xff]  }
  0xf9   :  { %1526 = vmatpush1.bf16.msra.mxu1 %v2845_v41  ;;  %v2983_v41 = vld [vmem:[%s3292_s5 + $0x58] sm:$0xff]  }
  0xfa   :  { %1527 = vmatprep.subr.bf16.mxu1 %v2850_v42  ;;  %v2938_v42 = vld [vmem:[#allocation5 + $0x130] ss:$8 sps:$4 sm:$0xff]  }
  0xfd   :  { %1528 = vmatpush1.bf16.msra.mxu1 %v2848_v43  ;;  %v2943_v43 = vld [vmem:[#allocation5 + $0x144] ss:$8 sps:$4 sm:$0xff]  }
  0xfe   :  { %1529 = vmatprep.subr.bf16.mxu1 %v2853_v44  ;;  %v2984_v44 = vld [vmem:[%s3292_s5 + $0x18] sm:$0xff]  }
 0x101   :  { %1530 = vmatpush1.bf16.msra.mxu1 %v2851_v22  ;;  %v2941_v22 = vld [vmem:[#allocation5 + $0x140] ss:$8 sps:$4 sm:$0xff]  }
 0x102   :  { %1531 = vmatprep.subr.bf16.mxu1 %v2856_v9  ;;  %v2986_v9 = vld [vmem:[%s3292_s5 + $0x20] sm:$0xff]  }
 0x105   :  { %1532 = vmatpush1.bf16.msra.mxu1 %v2854_v49  ;;  %v2944_v49 = vld [vmem:[#allocation5 + $0x150] ss:$8 sps:$4 sm:$0xff]  }
 0x106   :  { %1533 = vmatprep.subr.bf16.mxu1 %v2859_v51  ;;  %v2947_v51 = vld [vmem:[#allocation5 + $0x160] ss:$8 sps:$4 sm:$0xff]  }
 0x109   :  { %1534 = vmatpush1.bf16.msra.mxu1 %v2857_v52  ;;  %v2952_v52 = vld [vmem:[#allocation5 + $0x174] ss:$8 sps:$4 sm:$0xff]  }
 0x10a   :  { %1535 = vmatprep.subr.bf16.mxu1 %v2862_v54  ;;  %v2950_v54 = vld [vmem:[#allocation5 + $0x170] ss:$8 sps:$4 sm:$0xff]  }
 0x10d   :  { %1536 = vmatpush1.bf16.msra.mxu1 %v2860_v56  ;;  %v2953_v56 = vld [vmem:[#allocation5 + $0x180] ss:$8 sps:$4 sm:$0xff]  }
 0x10e   :  { %1537 = vmatprep.subr.bf16.mxu1 %v2865_v57  ;;  %v2958_v57 = vld [vmem:[#allocation5 + $0x194] ss:$8 sps:$4 sm:$0xff]  }
 0x111   :  { %1538 = vmatpush1.bf16.msra.mxu1 %v2863_v58  ;;  %v2956_v58 = vld [vmem:[#allocation5 + $0x190] ss:$8 sps:$4 sm:$0xff]  }
 0x112   :  { %1539 = vmatprep.subr.bf16.mxu1 %v2868_v59  ;;  %v2961_v59 = vld [vmem:[#allocation5 + $0x1a4] ss:$8 sps:$4 sm:$0xff]  }
 0x115   :  { %1540 = vmatpush1.bf16.msra.mxu1 %v2866_v60  ;;  %v2959_v60 = vld [vmem:[#allocation5 + $0x1a0] ss:$8 sps:$4 sm:$0xff]  }
 0x116   :  { %1541 = vmatprep.subr.bf16.mxu1 %v2871_v61  ;;  %v2964_v61 = vld [vmem:[#allocation5 + $0x1b4] ss:$8 sps:$4 sm:$0xff]  }
 0x119   :  { %1542 = vmatpush1.bf16.msra.mxu1 %v2869_v62  ;;  %v2962_v62 = vld [vmem:[#allocation5 + $0x1b0] ss:$8 sps:$4 sm:$0xff]  }
 0x11a   :  { %1543 = vmatprep.subr.bf16.mxu1 %v2874_v0  ;;  %v2967_v0 = vld [vmem:[#allocation5 + $0x1c4] ss:$8 sps:$4 sm:$0xff]  }
 0x11d   :  { %1544 = vmatpush1.bf16.msra.mxu1 %v2872_v1  ;;  %v2965_v1 = vld [vmem:[#allocation5 + $0x1c0] ss:$8 sps:$4 sm:$0xff]  }
 0x11e   :  { %1545 = vmatprep.subr.bf16.mxu1 %v2877_v53  ;;  %v2970_v53 = vld [vmem:[#allocation5 + $0x1d4] ss:$8 sps:$4 sm:$0xff]  }
 0x121   :  { %1546 = vmatpush1.bf16.msra.mxu1 %v2875_v2  ;;  %v2968_v2 = vld [vmem:[#allocation5 + $0x1d0] ss:$8 sps:$4 sm:$0xff]  }
 0x122   :  { %1547 = vmatprep.subr.bf16.mxu1 %v2880_v3  ;;  %v2973_v3 = vld [vmem:[#allocation5 + $0x1e4] ss:$8 sps:$4 sm:$0xff]  }
 0x125   :  { %1548 = vmatpush1.bf16.msra.mxu1 %v2878_v4  ;;  %v2971_v4 = vld [vmem:[#allocation5 + $0x1e0] ss:$8 sps:$4 sm:$0xff]  }
 0x126   :  { %2529 = vmatprep.subr.bf16.mxu1 %v2977_v32  ;;  %v1634_v32 = vld [vmem:[%s3291_s4] sm:$0x3] }
 0x128   :  { %1550 = vmatmul.mubr.bf16.vlgmr.msra.gmra.mrb[4].mxu1 %v3192_v34  ;;  %v339_v34 = vrot.slane %v3204_v11, %v338_v12 }
 0x129   :  { %2530 = vmatpush3.bf16.msra.mxu1 %v2978_v33  ;;  %v1639_v33 = vrot.slane %v1634_v32, %v334_v10 }
 0x12a   :  { %2531 = vmatprep.subr.bf16.mxu1 %v2979_v35  ;;  %v1643_v35 = vrot.slane %v1634_v32, %v338_v12 }
 0x12d   :  { %2532 = vmatpush3.bf16.msra.mxu1 %v2980_v38 }
 0x12e   :  { %2533 = vmatprep.subr.bf16.mxu1 %v2981_v39 }
 0x131   :  { %2534 = vmatpush3.bf16.msra.mxu1 %v2982_v63 }
 0x132   :  { %2535 = vmatprep.subr.bf16.mxu1 %v2983_v41 }
 0x135   :  { %2536 = vmatpush3.bf16.msra.mxu1 %v2984_v44 }
 0x136   :  { %2537 = vmatprep.subr.bf16.mxu1 %v2985_v45 }
 0x139   :  { %2538 = vmatpush3.bf16.msra.mxu1 %v2986_v9 }
 0x13a   :  { %2539 = vmatprep.subr.bf16.mxu1 %v2987_v48 }
 0x13b   :  { %v1346_v5 = vpop.f32.mrb[0].mxu1 }
 0x13c   :  { %v1348_v6 = vpop.f32.mrb[1].mxu1  ;;  %v1347_v14 = vadd.f32 %v1346_v5, %v335_v13  ;;  %v2976_v5 = vld [vmem:[#allocation5 + $0x1f4] ss:$8 sps:$4 sm:$0xff]  }
 0x13d   :  { %v1350_v7 = vpop.f32.mrb[2].mxu1  ;;  %v1349_v15 = vadd.f32 %v1348_v6, %v339_v34  ;;  %v2974_v6 = vld [vmem:[#allocation5 + $0x1f0] ss:$8 sps:$4 sm:$0xff]  }
 0x13e   :  { %v1351_v8 = vpop.f32.mrb[3].mxu1  ;;  %v342_v7 = vsub.s32 2, %v3143_v46 }
 0x13f   :  { %v346_v8 = vsub.s32 3, %v3143_v46  ;;  %v2512_v46 = vld [vmem:[%s3293_s6] ss:$0 sm:$0xff] }
 0x140   :  { %v343_v13 = vrot.slane %v3204_v11, %v342_v7 }
 0x141   :  { %v347_v34 = vrot.slane %v3204_v11, %v346_v8  ;;  %v2989_v11 = vld [vmem:[%s3292_s5 + $0x70] sm:$0xff]  }
 0x17c   :  { %v1428_v16 = vpop.f32.mrb[0].mxu0 }
 0x17d   :  { %v2552_v17 = vadd.f32 %v1428_v16, %v1347_v14  ;;  %v1430_v18 = vpop.f32.mrb[1].mxu0 }
 0x17e   :  { %v2554_v19 = vadd.f32 %v1430_v18, %v1349_v15  ;;  %v1432_v20 = vpop.f32.mrb[2].mxu0 }
 0x17f   :  { %v1558_v21 = vmul.f32 0.01, %v2552_v17  ;;  %v1433_v23 = vpop.f32.mrb[3].mxu0 }
 0x180   :  { %v1559_v24 = vmul.f32 0.01, %v2554_v19 }
 0x181   :  { %v1562_v26 = vmax.f32 %v2552_v17, %v1558_v21 }
 0x182   :  { %v1563_v27 = vmax.f32 %v2554_v19, %v1559_v24 }
 0x183   :  { %v1566_v30 = vpack.c.bf16 %v1562_v26, %v1562_v26 }
 0x184   :  { %v1567_v28 = vpack.c.bf16 %v1563_v27, %v1563_v27 }
 0x186   :  { %1998 = vmatprep.mubr.bf16.mxu0 %v1567_v28  ;;  %v2988_v28 = vld [vmem:[%s3292_s5 + $0x28] sm:$0xff]  }
 0x187   :  { %1999 = vmatmul.mubr.bf16.vlgmr.msra.gmra.mrb[4].mxu0 %v1566_v30  ;;  %2540 = vmatpush3.bf16.msra.mxu1 %v2988_v28  ;;  %v2991_v30 = vld [vmem:[%s3292_s5 + $0x78] sm:$0xff]  }
 0x188   :  { %2008 = vmatpush1.bf16.msra.mxu0 %v2929_v29  ;;  %v2990_v29 = vld [vmem:[%s3292_s5 + $0x30] sm:$0xff]   ;;  %2541 = vmatprep.subr.bf16.mxu1 %v2989_v11 }
 0x189   :  { %2009 = vmatprep.subr.bf16.mxu0 %v2934_v31  ;;  %v2992_v31 = vld [vmem:[%s3292_s5 + $0x38] sm:$0xff]  }
 0x18b   :  { %2542 = vmatpush3.bf16.msra.mxu1 %v2990_v29 }
 0x18c   :  { %2010 = vmatpush1.bf16.msra.mxu0 %v2932_v36  ;;  %2543 = vmatprep.subr.bf16.mxu1 %v2991_v30 }
 0x18d   :  { %2011 = vmatprep.subr.bf16.mxu0 %v2937_v37 }
 0x18f   :  { %2544 = vmatpush3.bf16.msra.mxu1 %v2992_v31 }
 0x190   :  { %2012 = vmatpush1.bf16.msra.mxu0 %v2935_v25 }
 0x191   :  { %2013 = vmatprep.subr.bf16.mxu0 %v2940_v40 }
 0x194   :  { %2014 = vmatpush1.bf16.msra.mxu0 %v2938_v42 }
 0x195   :  { %2015 = vmatprep.subr.bf16.mxu0 %v2943_v43 }
 0x198   :  { %2016 = vmatpush1.bf16.msra.mxu0 %v2941_v22 }
 0x199   :  { %2017 = vmatprep.subr.bf16.mxu0 %v2946_v47 }
 0x19c   :  { %2018 = vmatpush1.bf16.msra.mxu0 %v2944_v49 }
 0x19d   :  { %2019 = vmatprep.subr.bf16.mxu0 %v2949_v50 }
 0x1a0   :  { %2020 = vmatpush1.bf16.msra.mxu0 %v2947_v51 }
 0x1a1   :  { %2021 = vmatprep.subr.bf16.mxu0 %v2952_v52 }
 0x1a4   :  { %2022 = vmatpush1.bf16.msra.mxu0 %v2950_v54 }
 0x1a5   :  { %2023 = vmatprep.subr.bf16.mxu0 %v2955_v55 }
 0x1a8   :  { %2024 = vmatpush1.bf16.msra.mxu0 %v2953_v56 }
 0x1a9   :  { %2025 = vmatprep.subr.bf16.mxu0 %v2958_v57 }
 0x1ac   :  { %2026 = vmatpush1.bf16.msra.mxu0 %v2956_v58 }
 0x1ad   :  { %2027 = vmatprep.subr.bf16.mxu0 %v2961_v59 }
 0x1b0   :  { %2028 = vmatpush1.bf16.msra.mxu0 %v2959_v60 }
 0x1b1   :  { %2029 = vmatprep.subr.bf16.mxu0 %v2964_v61 }
 0x1b4   :  { %2030 = vmatpush1.bf16.msra.mxu0 %v2962_v62 }
 0x1b5   :  { %2031 = vmatprep.subr.bf16.mxu0 %v2967_v0 }
 0x1b8   :  { %2032 = vmatpush1.bf16.msra.mxu0 %v2965_v1 }
 0x1b9   :  { %2033 = vmatprep.subr.bf16.mxu0 %v2970_v53 }
 0x1bc   :  { %2034 = vmatpush1.bf16.msra.mxu0 %v2968_v2 }
 0x1bd   :  { %2035 = vmatprep.subr.bf16.mxu0 %v2973_v3 }
 0x1c0   :  { %2036 = vmatpush1.bf16.msra.mxu0 %v2971_v4 }
 0x1c1   :  { %2037 = vmatprep.subr.bf16.mxu0 %v2976_v5 }
 0x1c4   :  { %2038 = vmatpush1.bf16.msra.mxu0 %v2974_v6 }
 0x1fb   :  { %v1551_v14 = vpop.f32.mrb[4].mxu1 }
 0x1fc   :  { %v2555_v15 = vadd.f32 %v1551_v14, %v343_v13  ;;  %v1553_v16 = vpop.f32.mrb[5].mxu1 }
 0x1fd   :  { %v2556_v17 = vadd.f32 %v1553_v16, %v347_v34  ;;  %v1555_v18 = vpop.f32.mrb[6].mxu1 }
 0x1fe   :  { %v1560_v19 = vmul.f32 0.01, %v2555_v15  ;;  %v1556_v20 = vpop.f32.mrb[7].mxu1 }
 0x1ff   :  { %v1561_v21 = vmul.f32 0.01, %v2556_v17 }
 0x200   :  { %v1564_v23 = vmax.f32 %v2555_v15, %v1560_v19 }
 0x201   :  { %v1565_v24 = vmax.f32 %v2556_v17, %v1561_v21 }
 0x202   :  { %v1568_v27 = vpack.c.bf16 %v1564_v23, %v1564_v23 }
 0x203   :  { %v1569_v26 = vpack.c.bf16 %v1565_v24, %v1565_v24 }
 0x205   :  { %2039 = vmatprep.mubr.bf16.mxu0 %v1569_v26 }
 0x206   :  { %2040 = vmatmul.mubr.bf16.vlgmr.msra.gmra.mrb[4].mxu0 %v1568_v27 }
 0x2d9   :  { %v2041_v36 = vpop.f32.mrb[4].mxu0 }
 0x2da   :  { %v2557_v37 = vadd.f32 %v2041_v36, %v1639_v33  ;;  %v2043_v38 = vpop.f32.mrb[5].mxu0 }
 0x2db   :  { %v2558_v39 = vadd.f32 %v2043_v38, %v1643_v35  ;;  %v2045_v25 = vpop.f32.mrb[6].mxu0 }
 0x2dc   :  { %v2048_v40 = vmul.f32 0.01, %v2557_v37  ;;  %v2046_v63 = vpop.f32.mrb[7].mxu0 }
 0x2dd   :  { %v2049_v41 = vmul.f32 0.01, %v2558_v39 }
 0x2de   :  { %v2050_v42 = vmax.f32 %v2557_v37, %v2048_v40 }
 0x2df   :  { %v2051_v43 = vmax.f32 %v2558_v39, %v2049_v41 }
 0x2e0   :  { %v2052_v45 = vpack.c.bf16 %v2050_v42, %v2050_v42 }
 0x2e1   :  { %v2053_v44 = vpack.c.bf16 %v2051_v43, %v2051_v43 }
 0x2e3   :  { %2221 = vmatprep.mubr.bf16.mxu1 %v2053_v44 }
 0x2e4   :  { %2222 = vmatmul.mubr.bf16.vlgmr.msra.gmra.mrb[8].mxu1 %v2052_v45 }
 0x3b7   :  { %v2545_v22 = vpop.f32.mrb[8].mxu1 }
 0x3b8   :  { %v2546_v10 = vpop.f32.mrb[9].mxu1 }
 0x3b9   :  { %v2547_v12 = vadd.f32 %v2546_v10, %v2545_v22  ;;  %v2548_v47 = vpop.f32.mrb[10].mxu1 }
 0x3ba   :  { %v2549_v9 = vpop.f32.mrb[11].mxu1 }
 0x3bb   :  { %v2224_v48 = vadd.f32 %v2547_v12, %v2512_v46 }
 0x3bd   :  { %v2229_v49 = vmul.f32 0.01, %v2224_v48 }
 0x3bf   :  { %v2230_v50 = vmax.f32 %v2224_v48, %v2229_v49 }
 0x3c1   :  { %v2231_v51 = vsub.f32 0.0, %v2230_v50 }
 0x3c3   :  { %v2232_v52 = vmul.f32 1.442695, %v2231_v51 }
 0x3c5   :  { %2993 = vpow2.f32 %v2232_v52 }
 0x3cf   :  { %v2994_v54 = vpop.eup %2993 }
 0x3d0   :  { %v2234_v55 = vadd.f32 1.0, %v2994_v54 }
 0x3d2   :  { %2995 = vrcp.f32 %v2234_v55 }
 0x3dc   :  { %v2996_v56 = vpop.eup %2995 }
 0x3dd   :  { %2237 = vst.msk [vmem:[#allocation7] sm:$0xff] %vm2236_vm0, %v2996_v56 }
 0x3de   :  { %2242 = vsyncadd [#allocation4], 96  ;;  %s3076_s23 = smov [#allocation7]  }
 0x3df   :  { %s2243_s24 = sshll.u32 %s3076_s23, 4  ;;  %s2244_s24 = int_to_ptr.vmem [resolvable:$true] %s2243_s24 }
 0x3e0   :  { %s3041_s6 = scalar_lea.vmem %s2244_s24, 32  ;;  %s3045_s1 = scalar_lea.vmem %s2244_s24, 128 }
 0x3e1   :  { %p3042_p2 = scmp.ne.s32.totalorder %s2244_s24, %s3041_s6  ;;  %p3046_p3 = scmp.lt.s32.totalorder %s2244_s24, %s2244_s24 }
 0x3e2   :  { %p3047_p4 = scmp.lt.s32.totalorder %s3045_s1, %s3041_s6 }
 0x3e4   :  { %p3048_p5 = por %p3047_p4, %p3046_p3 }
 0x3e6   :  { %p3049_p6 = pnand %p3048_p5, %p3042_p2 }
 0x3e8   :  { %3052 = shalt.err (!%p3049_p6)
}
 0x3e9   :  { %s3053_s27 = scalar_lea.hbm %s3294_s7, 32 }
 0x3ea   :  { %p3054_p7 = scmp.ne.s32.totalorder %s3294_s7, %s3053_s27  ;;  %p3057_p8 = scmp.lt.u32.totalorder %s3053_s27, %s3294_s7 }
 0x3ec   :  { %p3059_p9 = pnand %p3057_p8, %p3054_p7 }
 0x3ee   :  { %3062 = shalt.err (!%p3059_p9)
}
 0x3ef   :  { %s3077_s8 = smov 32   ;;  %s3078_s9 = smov 2  }
 0x3f0   :  { %2249 = dma.vmem_to_hbm [thread:$0]  %s2244_s24, 32, %s3294_s7, [#allocation4], %s3077_s8, %s3077_s8, %s3078_s9  }
 0x3f1   :  { %3067 = dma.done.wait [#allocation4], 128  }
 0x3f2   :  { %3068 = vsyncadd [#allocation4], 4294967168 }
 0x3f3   :  { %2253 = vsyncpa [#allocation3], 1 }
 0x3f4   :  { %2254 = vsyncpa [#allocation6], 1 }
 0x3f5   :  { %2255 = vsyncpa [#allocation4], 1 }

</bundles_post_ra>
